<compile_context>
chip_gen: v5e
topology: v5e:2x2
jax: 0.10.0
libtpu: 0.0.40
codegen_flags: <defaults>
</compile_context>

<pallas_src>
import jax
import jax.numpy as jnp
from jax.experimental import pallas as pl
from jax.experimental.pallas import tpu as pltpu  # noqa: F401  (used for the scaling plan above)

_BN_EPS = 1e-5      # torch.nn.BatchNorm1d default eps
_NORM_EPS = 1e-12   # torch.nn.functional.normalize default eps


# ---------------------------------------------------------------------------
# In-kernel helpers
# ---------------------------------------------------------------------------
def _bn_relu_rownorm(y, gamma, beta):
    """BatchNorm1d (training batch stats, biased var) -> ReLU -> F.normalize(dim=1).

    Linear bias is intentionally absent: with batch-stat BN it is exactly
    cancelled by the mean subtraction.  gamma is folded into the BN scale so
    only one full-tile multiply is issued; the final divide is an EUP rsqrt.
    """
    mean = jnp.mean(y, axis=0, keepdims=True)
    var = jnp.mean((y - mean) ** 2, axis=0, keepdims=True)        # biased, as torch BN
    scale = gamma * jax.lax.rsqrt(var + _BN_EPS)                  # (1, d) row op
    y = (y - mean) * scale + beta
    y = jnp.maximum(y, 0.0)                                       # ReLU
    sumsq = jnp.sum(y * y, axis=1, keepdims=True)                 # (n, 1)
    # torch F.normalize: x / max(||x||, eps)  ==  x * rsqrt(max(sum(x^2), eps^2))
    return y * jax.lax.rsqrt(jnp.maximum(sumsq, _NORM_EPS * _NORM_EPS))


def _full_mean(x):   # (1, 1) mean of a 2-D tile (lane reduce, then sublane)
    return jnp.mean(jnp.mean(x, axis=1, keepdims=True), axis=0, keepdims=True)


def _full_sum(x):    # (1, 1) sum of a 2-D tile
    return jnp.sum(jnp.sum(x, axis=1, keepdims=True), axis=0, keepdims=True)


# ---------------------------------------------------------------------------
# Fused kernel: single invocation handles BOTH views end-to-end
# (shared encoder -> self-expression -> shared decoder -> all loss reductions).
# ---------------------------------------------------------------------------
def _fused_kernel(h1_ref, h2_ref, w1_ref, w2_ref,
                  we_ref, gbe_ref, wd_ref, gbd_ref,
                  coef1_ref, coef2_ref, loss_ref):
    n = h1_ref.shape[0]

    h1 = h1_ref[...]                                   # (n, d_in)
    h2 = h2_ref[...]                                   # (n, d_in)

    # ---- shared encoder: one batched matmul, per-view BN stats -------------
    h = jnp.concatenate([h1, h2], axis=0)              # (2n, d_in)
    ye = jnp.dot(h, we_ref[...], preferred_element_type=jnp.float32)   # (2n, d_lat)
    gbe = gbe_ref[...]                                  # (2, d_lat): [gamma; beta]
    z1 = _bn_relu_rownorm(ye[:n, :], gbe[0:1, :], gbe[1:2, :])
    z2 = _bn_relu_rownorm(ye[n:, :], gbe[0:1, :], gbe[1:2, :])

    # ---- self-expression: coef = weight - diag(diag(weight)); ZC = coef @ Z
    row = jax.lax.broadcasted_iota(jnp.int32, (n, n), 0)
    col = jax.lax.broadcasted_iota(jnp.int32, (n, n), 1)
    off_diag = row != col
    coef1 = jnp.where(off_diag, w1_ref[...], 0.0)
    coef2 = jnp.where(off_diag, w2_ref[...], 0.0)
    coef1_ref[...] = coef1
    coef2_ref[...] = coef2
    zc1 = jnp.dot(coef1, z1, preferred_element_type=jnp.float32)
    zc2 = jnp.dot(coef2, z2, preferred_element_type=jnp.float32)

    # ---- shared decoder: one batched matmul, per-view BN stats -------------
    zc = jnp.concatenate([zc1, zc2], axis=0)            # (2n, d_lat)
    yd = jnp.dot(zc, wd_ref[...], preferred_element_type=jnp.float32)   # (2n, d_in)
    gbd = gbd_ref[...]                                   # (2, d_in): [gamma; beta]
    h1_rec = _bn_relu_rownorm(yd[:n, :], gbd[0:1, :], gbd[1:2, :])
    h2_rec = _bn_relu_rownorm(yd[n:, :], gbd[0:1, :], gbd[1:2, :])

    # ---- losses, both views summed in-kernel --------------------------------
    d1 = h1 - h1_rec
    d2 = h2 - h2_rec
    ft = _full_mean(d1 * d1) + _full_mean(d2 * d2)                      # (1, 1)
    e1 = z1 - zc1
    e2 = z2 - zc2
    se = 0.5 * (_full_mean(e1 * e1) + _full_mean(e2 * e2))              # (1, 1)
    creg = _full_sum(jnp.abs(coef1)) + _full_sum(jnp.abs(coef2))        # (1, 1)

    # single lane-dense (1, 128) row: lane 0 = ft, lane 1 = SE, lane 2 = C_Reg
    lane = jax.lax.broadcasted_iota(jnp.int32, (1, 128), 1)
    loss_ref[...] = (jnp.where(lane == 0, ft, 0.0)
                     + jnp.where(lane == 1, se, 0.0)
                     + jnp.where(lane == 2, creg, 0.0))


# ---------------------------------------------------------------------------
# Wrapper == CommonMLPEncoder.forward(H1, H2)
# ---------------------------------------------------------------------------
def common_mlp_encoder_forward(params, H1, H2):
    n, _ = H1.shape
    w_e, _b_e, g_e, beta_e = params["enc"]   # Linear bias unused: cancelled by batch-stat BN
    w_d, _b_d, g_d, beta_d = params["dec"]

    enc_gb = jnp.concatenate([g_e, beta_e], axis=0)     # (2, d_lat)
    dec_gb = jnp.concatenate([g_d, beta_d], axis=0)     # (2, d_in)

    # Grid-less, whole-array-VMEM call: every intermediate (Z, ZC, H_) stays in
    # vregs/VMEM, all stages and reductions run in one launch.
    coef1, coef2, loss_row = pl.pallas_call(
        _fused_kernel,
        out_shape=(jax.ShapeDtypeStruct((n, n), jnp.float32),
                   jax.ShapeDtypeStruct((n, n), jnp.float32),
                   jax.ShapeDtypeStruct((1, 128), jnp.float32)),
    )(H1, H2, params["weight1"], params["weight2"], w_e, enc_gb, w_d, dec_gb)

    ft_loss = loss_row[0, 0]
    SE_loss = loss_row[0, 1]
    C_Regular = loss_row[0, 2]
    loss = ft_loss + SE_loss + C_Regular
    return coef1, coef2, loss, ft_loss, SE_loss, C_Regular


# ---------------------------------------------------------------------------
# Deterministic parameter init (torch.nn.Linear-style uniform; BN gamma=1/beta=0)
# ---------------------------------------------------------------------------
def init_surefc(key, din, dout):
    k1, k2 = jax.random.split(key)
    lim = 1.0 / (din ** 0.5)
    w = jax.random.uniform(k1, (din, dout), jnp.float32, -lim, lim)
    # bias kept for torch parameter parity but never enters the kernel: with
    # training-mode BatchNorm right after the Linear, it is exactly cancelled.
    b = jax.random.uniform(k2, (1, dout), jnp.float32, -lim, lim)
    gamma = jnp.ones((1, dout), jnp.float32)
    beta = jnp.zeros((1, dout), jnp.float32)
    return (w, b, gamma, beta)


if __name__ == "__main__":
    # args.n_nodes / args.hidden2 / args.hidden3 (small synthetic config)
    N_NODES, HIDDEN2, HIDDEN3 = 8, 32, 16

    key = jax.random.PRNGKey(0)
    k_enc, k_dec, k_h1, k_h2 = jax.random.split(key, 4)

    params = {
        "enc": init_surefc(k_enc, HIDDEN2, HIDDEN3),
        "dec": init_surefc(k_dec, HIDDEN3, HIDDEN2),
        # self-expression weights exactly as in __init__
        "weight1": 1e-4 * jnp.ones((N_NODES, N_NODES), jnp.float32),
        "weight2": 1e-4 * jnp.ones((N_NODES, N_NODES), jnp.float32),
    }
    H1 = jax.random.normal(k_h1, (N_NODES, HIDDEN2), jnp.float32)
    H2 = jax.random.normal(k_h2, (N_NODES, HIDDEN2), jnp.float32)

    fwd = jax.jit(common_mlp_encoder_forward)
    outs = fwd(params, H1, H2)   # (coef1, coef2, loss, ft_loss, SE_loss, C_Regular)
    outs = jax.block_until_ready(outs)
    print("KERNEL_OK")
</pallas_src>

<mosaic_0001>
module attributes {stable_mosaic.version = 11 : i64} {
  func.func @_fused_kernel(%arg0: memref<8x32xf32, #tpu.memory_space<vmem>>, %arg1: memref<8x32xf32, #tpu.memory_space<vmem>>, %arg2: memref<8x8xf32, #tpu.memory_space<vmem>>, %arg3: memref<8x8xf32, #tpu.memory_space<vmem>>, %arg4: memref<32x16xf32, #tpu.memory_space<vmem>>, %arg5: memref<2x16xf32, #tpu.memory_space<vmem>>, %arg6: memref<16x32xf32, #tpu.memory_space<vmem>>, %arg7: memref<2x32xf32, #tpu.memory_space<vmem>>, %arg8: memref<8x8xf32, #tpu.memory_space<vmem>>, %arg9: memref<8x8xf32, #tpu.memory_space<vmem>>, %arg10: memref<1x128xf32, #tpu.memory_space<vmem>>) attributes {dimension_semantics = [], scalar_prefetch = 0 : i64, scratch_operands = 0 : i64, tpu.core_type = #tpu.core_type<tc>} {
    %c0 = arith.constant 0 : index
    %c0_0 = arith.constant 0 : index
    %0 = vector.load %arg0[%c0, %c0_0] : memref<8x32xf32, #tpu.memory_space<vmem>>, vector<8x32xf32>
    %c0_1 = arith.constant 0 : index
    %c0_2 = arith.constant 0 : index
    %1 = vector.load %arg1[%c0_1, %c0_2] : memref<8x32xf32, #tpu.memory_space<vmem>>, vector<8x32xf32>
    %2 = tpu.concatenate %0, %1 in 0 : vector<8x32xf32>, vector<8x32xf32> -> vector<16x32xf32>
    %c0_3 = arith.constant 0 : index
    %c0_4 = arith.constant 0 : index
    %3 = vector.load %arg4[%c0_3, %c0_4] : memref<32x16xf32, #tpu.memory_space<vmem>>, vector<32x16xf32>
    %cst = arith.constant dense<0.000000e+00> : vector<16x16xf32>
    %4 = tpu.matmul %2, %3, %cst {dimension_numbers = #tpu.dot_dimension_numbers<[1], [0], [0], [1], [0, 0, 1, 1], [], []>} : vector<16x32xf32>, vector<32x16xf32>, vector<16x16xf32> -> vector<16x16xf32>
    %c0_5 = arith.constant 0 : index
    %c0_6 = arith.constant 0 : index
    %5 = vector.load %arg5[%c0_5, %c0_6] : memref<2x16xf32, #tpu.memory_space<vmem>>, vector<2x16xf32>
    %6 = vector.extract_strided_slice %4 {offsets = [0, 0], sizes = [8, 16], strides = [1, 1]} : vector<16x16xf32> to vector<8x16xf32>
    %7 = vector.extract_strided_slice %5 {offsets = [0, 0], sizes = [1, 16], strides = [1, 1]} : vector<2x16xf32> to vector<1x16xf32>
    %8 = vector.extract_strided_slice %5 {offsets = [1, 0], sizes = [1, 16], strides = [1, 1]} : vector<2x16xf32> to vector<1x16xf32>
    %cst_7 = arith.constant dense<0.000000e+00> : vector<16xf32>
    %9 = vector.multi_reduction <add>, %6, %cst_7 [0] : vector<8x16xf32> to vector<16xf32>
    %10 = vector.shape_cast %9 : vector<16xf32> to vector<1x16xf32>
    %cst_8 = arith.constant 8.000000e+00 : f32
    %11 = vector.broadcast %cst_8 : f32 to vector<1x16xf32>
    %12 = arith.divf %10, %11 : vector<1x16xf32>
    %13 = vector.broadcast %12 : vector<1x16xf32> to vector<8x16xf32>
    %14 = arith.subf %6, %13 : vector<8x16xf32>
    %15 = arith.mulf %14, %14 : vector<8x16xf32>
    %cst_9 = arith.constant dense<0.000000e+00> : vector<16xf32>
    %16 = vector.multi_reduction <add>, %15, %cst_9 [0] : vector<8x16xf32> to vector<16xf32>
    %17 = vector.shape_cast %16 : vector<16xf32> to vector<1x16xf32>
    %cst_10 = arith.constant 8.000000e+00 : f32
    %18 = vector.broadcast %cst_10 : f32 to vector<1x16xf32>
    %19 = arith.divf %17, %18 : vector<1x16xf32>
    %cst_11 = arith.constant 9.99999974E-6 : f32
    %20 = vector.broadcast %cst_11 : f32 to vector<1x16xf32>
    %21 = arith.addf %19, %20 : vector<1x16xf32>
    %22 = math.rsqrt %21 : vector<1x16xf32>
    %23 = arith.mulf %7, %22 : vector<1x16xf32>
    %24 = vector.broadcast %12 : vector<1x16xf32> to vector<8x16xf32>
    %25 = arith.subf %6, %24 : vector<8x16xf32>
    %26 = vector.broadcast %23 : vector<1x16xf32> to vector<8x16xf32>
    %27 = arith.mulf %25, %26 : vector<8x16xf32>
    %28 = vector.broadcast %8 : vector<1x16xf32> to vector<8x16xf32>
    %29 = arith.addf %27, %28 : vector<8x16xf32>
    %cst_12 = arith.constant 0.000000e+00 : f32
    %30 = vector.broadcast %cst_12 : f32 to vector<8x16xf32>
    %31 = arith.maximumf %29, %30 : vector<8x16xf32>
    %32 = arith.mulf %31, %31 : vector<8x16xf32>
    %cst_13 = arith.constant dense<0.000000e+00> : vector<8xf32>
    %33 = vector.multi_reduction <add>, %32, %cst_13 [1] : vector<8x16xf32> to vector<8xf32>
    %34 = vector.shape_cast %33 : vector<8xf32> to vector<8x1xf32>
    %cst_14 = arith.constant 1.000000e-24 : f32
    %35 = vector.broadcast %cst_14 : f32 to vector<8x1xf32>
    %36 = arith.maximumf %34, %35 : vector<8x1xf32>
    %37 = math.rsqrt %36 : vector<8x1xf32>
    %38 = vector.broadcast %37 : vector<8x1xf32> to vector<8x16xf32>
    %39 = arith.mulf %31, %38 : vector<8x16xf32>
    %40 = vector.extract_strided_slice %4 {offsets = [8, 0], sizes = [8, 16], strides = [1, 1]} : vector<16x16xf32> to vector<8x16xf32>
    %41 = vector.extract_strided_slice %5 {offsets = [0, 0], sizes = [1, 16], strides = [1, 1]} : vector<2x16xf32> to vector<1x16xf32>
    %42 = vector.extract_strided_slice %5 {offsets = [1, 0], sizes = [1, 16], strides = [1, 1]} : vector<2x16xf32> to vector<1x16xf32>
    %cst_15 = arith.constant dense<0.000000e+00> : vector<16xf32>
    %43 = vector.multi_reduction <add>, %40, %cst_15 [0] : vector<8x16xf32> to vector<16xf32>
    %44 = vector.shape_cast %43 : vector<16xf32> to vector<1x16xf32>
    %cst_16 = arith.constant 8.000000e+00 : f32
    %45 = vector.broadcast %cst_16 : f32 to vector<1x16xf32>
    %46 = arith.divf %44, %45 : vector<1x16xf32>
    %47 = vector.broadcast %46 : vector<1x16xf32> to vector<8x16xf32>
    %48 = arith.subf %40, %47 : vector<8x16xf32>
    %49 = arith.mulf %48, %48 : vector<8x16xf32>
    %cst_17 = arith.constant dense<0.000000e+00> : vector<16xf32>
    %50 = vector.multi_reduction <add>, %49, %cst_17 [0] : vector<8x16xf32> to vector<16xf32>
    %51 = vector.shape_cast %50 : vector<16xf32> to vector<1x16xf32>
    %cst_18 = arith.constant 8.000000e+00 : f32
    %52 = vector.broadcast %cst_18 : f32 to vector<1x16xf32>
    %53 = arith.divf %51, %52 : vector<1x16xf32>
    %cst_19 = arith.constant 9.99999974E-6 : f32
    %54 = vector.broadcast %cst_19 : f32 to vector<1x16xf32>
    %55 = arith.addf %53, %54 : vector<1x16xf32>
    %56 = math.rsqrt %55 : vector<1x16xf32>
    %57 = arith.mulf %41, %56 : vector<1x16xf32>
    %58 = vector.broadcast %46 : vector<1x16xf32> to vector<8x16xf32>
    %59 = arith.subf %40, %58 : vector<8x16xf32>
    %60 = vector.broadcast %57 : vector<1x16xf32> to vector<8x16xf32>
    %61 = arith.mulf %59, %60 : vector<8x16xf32>
    %62 = vector.broadcast %42 : vector<1x16xf32> to vector<8x16xf32>
    %63 = arith.addf %61, %62 : vector<8x16xf32>
    %cst_20 = arith.constant 0.000000e+00 : f32
    %64 = vector.broadcast %cst_20 : f32 to vector<8x16xf32>
    %65 = arith.maximumf %63, %64 : vector<8x16xf32>
    %66 = arith.mulf %65, %65 : vector<8x16xf32>
    %cst_21 = arith.constant dense<0.000000e+00> : vector<8xf32>
    %67 = vector.multi_reduction <add>, %66, %cst_21 [1] : vector<8x16xf32> to vector<8xf32>
    %68 = vector.shape_cast %67 : vector<8xf32> to vector<8x1xf32>
    %cst_22 = arith.constant 1.000000e-24 : f32
    %69 = vector.broadcast %cst_22 : f32 to vector<8x1xf32>
    %70 = arith.maximumf %68, %69 : vector<8x1xf32>
    %71 = math.rsqrt %70 : vector<8x1xf32>
    %72 = vector.broadcast %71 : vector<8x1xf32> to vector<8x16xf32>
    %73 = arith.mulf %65, %72 : vector<8x16xf32>
    %74 = tpu.iota {dimensions = array<i32: 0>} : vector<8x8xi32>
    %75 = tpu.iota {dimensions = array<i32: 1>} : vector<8x8xi32>
    %76 = arith.cmpi ne, %74, %75 : vector<8x8xi32>
    %c0_23 = arith.constant 0 : index
    %c0_24 = arith.constant 0 : index
    %77 = vector.load %arg2[%c0_23, %c0_24] : memref<8x8xf32, #tpu.memory_space<vmem>>, vector<8x8xf32>
    %cst_25 = arith.constant 0.000000e+00 : f32
    %78 = vector.broadcast %cst_25 : f32 to vector<8x8xf32>
    %79 = arith.select %76, %77, %78 : vector<8x8xi1>, vector<8x8xf32>
    %c0_26 = arith.constant 0 : index
    %c0_27 = arith.constant 0 : index
    %80 = vector.load %arg3[%c0_26, %c0_27] : memref<8x8xf32, #tpu.memory_space<vmem>>, vector<8x8xf32>
    %cst_28 = arith.constant 0.000000e+00 : f32
    %81 = vector.broadcast %cst_28 : f32 to vector<8x8xf32>
    %82 = arith.select %76, %80, %81 : vector<8x8xi1>, vector<8x8xf32>
    %c0_29 = arith.constant 0 : index
    %c0_30 = arith.constant 0 : index
    %83 = vector.load %arg8[%c0_29, %c0_30] : memref<8x8xf32, #tpu.memory_space<vmem>>, vector<8x8xf32>
    tpu.vector_store %arg8[%c0_29, %c0_30], %79 {strides = array<i32>} : memref<8x8xf32, #tpu.memory_space<vmem>>, vector<8x8xf32>,
    %c0_31 = arith.constant 0 : index
    %c0_32 = arith.constant 0 : index
    %84 = vector.load %arg9[%c0_31, %c0_32] : memref<8x8xf32, #tpu.memory_space<vmem>>, vector<8x8xf32>
    tpu.vector_store %arg9[%c0_31, %c0_32], %82 {strides = array<i32>} : memref<8x8xf32, #tpu.memory_space<vmem>>, vector<8x8xf32>,
    %cst_33 = arith.constant dense<0.000000e+00> : vector<8x16xf32>
    %85 = tpu.matmul %79, %39, %cst_33 {dimension_numbers = #tpu.dot_dimension_numbers<[1], [0], [0], [1], [0, 0, 1, 1], [], []>} : vector<8x8xf32>, vector<8x16xf32>, vector<8x16xf32> -> vector<8x16xf32>
    %cst_34 = arith.constant dense<0.000000e+00> : vector<8x16xf32>
    %86 = tpu.matmul %82, %73, %cst_34 {dimension_numbers = #tpu.dot_dimension_numbers<[1], [0], [0], [1], [0, 0, 1, 1], [], []>} : vector<8x8xf32>, vector<8x16xf32>, vector<8x16xf32> -> vector<8x16xf32>
    %87 = tpu.concatenate %85, %86 in 0 : vector<8x16xf32>, vector<8x16xf32> -> vector<16x16xf32>
    %c0_35 = arith.constant 0 : index
    %c0_36 = arith.constant 0 : index
    %88 = vector.load %arg6[%c0_35, %c0_36] : memref<16x32xf32, #tpu.memory_space<vmem>>, vector<16x32xf32>
    %cst_37 = arith.constant dense<0.000000e+00> : vector<16x32xf32>
    %89 = tpu.matmul %87, %88, %cst_37 {dimension_numbers = #tpu.dot_dimension_numbers<[1], [0], [0], [1], [0, 0, 1, 1], [], []>} : vector<16x16xf32>, vector<16x32xf32>, vector<16x32xf32> -> vector<16x32xf32>
    %c0_38 = arith.constant 0 : index
    %c0_39 = arith.constant 0 : index
    %90 = vector.load %arg7[%c0_38, %c0_39] : memref<2x32xf32, #tpu.memory_space<vmem>>, vector<2x32xf32>
    %91 = vector.extract_strided_slice %89 {offsets = [0, 0], sizes = [8, 32], strides = [1, 1]} : vector<16x32xf32> to vector<8x32xf32>
    %92 = vector.extract_strided_slice %90 {offsets = [0, 0], sizes = [1, 32], strides = [1, 1]} : vector<2x32xf32> to vector<1x32xf32>
    %93 = vector.extract_strided_slice %90 {offsets = [1, 0], sizes = [1, 32], strides = [1, 1]} : vector<2x32xf32> to vector<1x32xf32>
    %cst_40 = arith.constant dense<0.000000e+00> : vector<32xf32>
    %94 = vector.multi_reduction <add>, %91, %cst_40 [0] : vector<8x32xf32> to vector<32xf32>
    %95 = vector.shape_cast %94 : vector<32xf32> to vector<1x32xf32>
    %cst_41 = arith.constant 8.000000e+00 : f32
    %96 = vector.broadcast %cst_41 : f32 to vector<1x32xf32>
    %97 = arith.divf %95, %96 : vector<1x32xf32>
    %98 = vector.broadcast %97 : vector<1x32xf32> to vector<8x32xf32>
    %99 = arith.subf %91, %98 : vector<8x32xf32>
    %100 = arith.mulf %99, %99 : vector<8x32xf32>
    %cst_42 = arith.constant dense<0.000000e+00> : vector<32xf32>
    %101 = vector.multi_reduction <add>, %100, %cst_42 [0] : vector<8x32xf32> to vector<32xf32>
    %102 = vector.shape_cast %101 : vector<32xf32> to vector<1x32xf32>
    %cst_43 = arith.constant 8.000000e+00 : f32
    %103 = vector.broadcast %cst_43 : f32 to vector<1x32xf32>
    %104 = arith.divf %102, %103 : vector<1x32xf32>
    %cst_44 = arith.constant 9.99999974E-6 : f32
    %105 = vector.broadcast %cst_44 : f32 to vector<1x32xf32>
    %106 = arith.addf %104, %105 : vector<1x32xf32>
    %107 = math.rsqrt %106 : vector<1x32xf32>
    %108 = arith.mulf %92, %107 : vector<1x32xf32>
    %109 = vector.broadcast %97 : vector<1x32xf32> to vector<8x32xf32>
    %110 = arith.subf %91, %109 : vector<8x32xf32>
    %111 = vector.broadcast %108 : vector<1x32xf32> to vector<8x32xf32>
    %112 = arith.mulf %110, %111 : vector<8x32xf32>
    %113 = vector.broadcast %93 : vector<1x32xf32> to vector<8x32xf32>
    %114 = arith.addf %112, %113 : vector<8x32xf32>
    %cst_45 = arith.constant 0.000000e+00 : f32
    %115 = vector.broadcast %cst_45 : f32 to vector<8x32xf32>
    %116 = arith.maximumf %114, %115 : vector<8x32xf32>
    %117 = arith.mulf %116, %116 : vector<8x32xf32>
    %cst_46 = arith.constant dense<0.000000e+00> : vector<8xf32>
    %118 = vector.multi_reduction <add>, %117, %cst_46 [1] : vector<8x32xf32> to vector<8xf32>
    %119 = vector.shape_cast %118 : vector<8xf32> to vector<8x1xf32>
    %cst_47 = arith.constant 1.000000e-24 : f32
    %120 = vector.broadcast %cst_47 : f32 to vector<8x1xf32>
    %121 = arith.maximumf %119, %120 : vector<8x1xf32>
    %122 = math.rsqrt %121 : vector<8x1xf32>
    %123 = vector.broadcast %122 : vector<8x1xf32> to vector<8x32xf32>
    %124 = arith.mulf %116, %123 : vector<8x32xf32>
    %125 = vector.extract_strided_slice %89 {offsets = [8, 0], sizes = [8, 32], strides = [1, 1]} : vector<16x32xf32> to vector<8x32xf32>
    %126 = vector.extract_strided_slice %90 {offsets = [0, 0], sizes = [1, 32], strides = [1, 1]} : vector<2x32xf32> to vector<1x32xf32>
    %127 = vector.extract_strided_slice %90 {offsets = [1, 0], sizes = [1, 32], strides = [1, 1]} : vector<2x32xf32> to vector<1x32xf32>
    %cst_48 = arith.constant dense<0.000000e+00> : vector<32xf32>
    %128 = vector.multi_reduction <add>, %125, %cst_48 [0] : vector<8x32xf32> to vector<32xf32>
    %129 = vector.shape_cast %128 : vector<32xf32> to vector<1x32xf32>
    %cst_49 = arith.constant 8.000000e+00 : f32
    %130 = vector.broadcast %cst_49 : f32 to vector<1x32xf32>
    %131 = arith.divf %129, %130 : vector<1x32xf32>
    %132 = vector.broadcast %131 : vector<1x32xf32> to vector<8x32xf32>
    %133 = arith.subf %125, %132 : vector<8x32xf32>
    %134 = arith.mulf %133, %133 : vector<8x32xf32>
    %cst_50 = arith.constant dense<0.000000e+00> : vector<32xf32>
    %135 = vector.multi_reduction <add>, %134, %cst_50 [0] : vector<8x32xf32> to vector<32xf32>
    %136 = vector.shape_cast %135 : vector<32xf32> to vector<1x32xf32>
    %cst_51 = arith.constant 8.000000e+00 : f32
    %137 = vector.broadcast %cst_51 : f32 to vector<1x32xf32>
    %138 = arith.divf %136, %137 : vector<1x32xf32>
    %cst_52 = arith.constant 9.99999974E-6 : f32
    %139 = vector.broadcast %cst_52 : f32 to vector<1x32xf32>
    %140 = arith.addf %138, %139 : vector<1x32xf32>
    %141 = math.rsqrt %140 : vector<1x32xf32>
    %142 = arith.mulf %126, %141 : vector<1x32xf32>
    %143 = vector.broadcast %131 : vector<1x32xf32> to vector<8x32xf32>
    %144 = arith.subf %125, %143 : vector<8x32xf32>
    %145 = vector.broadcast %142 : vector<1x32xf32> to vector<8x32xf32>
    %146 = arith.mulf %144, %145 : vector<8x32xf32>
    %147 = vector.broadcast %127 : vector<1x32xf32> to vector<8x32xf32>
    %148 = arith.addf %146, %147 : vector<8x32xf32>
    %cst_53 = arith.constant 0.000000e+00 : f32
    %149 = vector.broadcast %cst_53 : f32 to vector<8x32xf32>
    %150 = arith.maximumf %148, %149 : vector<8x32xf32>
    %151 = arith.mulf %150, %150 : vector<8x32xf32>
    %cst_54 = arith.constant dense<0.000000e+00> : vector<8xf32>
    %152 = vector.multi_reduction <add>, %151, %cst_54 [1] : vector<8x32xf32> to vector<8xf32>
    %153 = vector.shape_cast %152 : vector<8xf32> to vector<8x1xf32>
    %cst_55 = arith.constant 1.000000e-24 : f32
    %154 = vector.broadcast %cst_55 : f32 to vector<8x1xf32>
    %155 = arith.maximumf %153, %154 : vector<8x1xf32>
    %156 = math.rsqrt %155 : vector<8x1xf32>
    %157 = vector.broadcast %156 : vector<8x1xf32> to vector<8x32xf32>
    %158 = arith.mulf %150, %157 : vector<8x32xf32>
    %159 = arith.subf %0, %124 : vector<8x32xf32>
    %160 = arith.subf %1, %158 : vector<8x32xf32>
    %161 = arith.mulf %159, %159 : vector<8x32xf32>
    %cst_56 = arith.constant dense<0.000000e+00> : vector<8xf32>
    %162 = vector.multi_reduction <add>, %161, %cst_56 [1] : vector<8x32xf32> to vector<8xf32>
    %163 = vector.shape_cast %162 : vector<8xf32> to vector<8x1xf32>
    %cst_57 = arith.constant 3.200000e+01 : f32
    %164 = vector.broadcast %cst_57 : f32 to vector<8x1xf32>
    %165 = arith.divf %163, %164 : vector<8x1xf32>
    %cst_58 = arith.constant dense<0.000000e+00> : vector<1xf32>
    %166 = vector.multi_reduction <add>, %165, %cst_58 [0] : vector<8x1xf32> to vector<1xf32>
    %167 = vector.shape_cast %166 : vector<1xf32> to vector<1x1xf32>
    %cst_59 = arith.constant 8.000000e+00 : f32
    %168 = vector.broadcast %cst_59 : f32 to vector<1x1xf32>
    %169 = arith.divf %167, %168 : vector<1x1xf32>
    %170 = arith.mulf %160, %160 : vector<8x32xf32>
    %cst_60 = arith.constant dense<0.000000e+00> : vector<8xf32>
    %171 = vector.multi_reduction <add>, %170, %cst_60 [1] : vector<8x32xf32> to vector<8xf32>
    %172 = vector.shape_cast %171 : vector<8xf32> to vector<8x1xf32>
    %cst_61 = arith.constant 3.200000e+01 : f32
    %173 = vector.broadcast %cst_61 : f32 to vector<8x1xf32>
    %174 = arith.divf %172, %173 : vector<8x1xf32>
    %cst_62 = arith.constant dense<0.000000e+00> : vector<1xf32>
    %175 = vector.multi_reduction <add>, %174, %cst_62 [0] : vector<8x1xf32> to vector<1xf32>
    %176 = vector.shape_cast %175 : vector<1xf32> to vector<1x1xf32>
    %cst_63 = arith.constant 8.000000e+00 : f32
    %177 = vector.broadcast %cst_63 : f32 to vector<1x1xf32>
    %178 = arith.divf %176, %177 : vector<1x1xf32>
    %179 = arith.addf %169, %178 : vector<1x1xf32>
    %180 = arith.subf %39, %85 : vector<8x16xf32>
    %181 = arith.subf %73, %86 : vector<8x16xf32>
    %182 = arith.mulf %180, %180 : vector<8x16xf32>
    %cst_64 = arith.constant dense<0.000000e+00> : vector<8xf32>
    %183 = vector.multi_reduction <add>, %182, %cst_64 [1] : vector<8x16xf32> to vector<8xf32>
    %184 = vector.shape_cast %183 : vector<8xf32> to vector<8x1xf32>
    %cst_65 = arith.constant 1.600000e+01 : f32
    %185 = vector.broadcast %cst_65 : f32 to vector<8x1xf32>
    %186 = arith.divf %184, %185 : vector<8x1xf32>
    %cst_66 = arith.constant dense<0.000000e+00> : vector<1xf32>
    %187 = vector.multi_reduction <add>, %186, %cst_66 [0] : vector<8x1xf32> to vector<1xf32>
    %188 = vector.shape_cast %187 : vector<1xf32> to vector<1x1xf32>
    %cst_67 = arith.constant 8.000000e+00 : f32
    %189 = vector.broadcast %cst_67 : f32 to vector<1x1xf32>
    %190 = arith.divf %188, %189 : vector<1x1xf32>
    %191 = arith.mulf %181, %181 : vector<8x16xf32>
    %cst_68 = arith.constant dense<0.000000e+00> : vector<8xf32>
    %192 = vector.multi_reduction <add>, %191, %cst_68 [1] : vector<8x16xf32> to vector<8xf32>
    %193 = vector.shape_cast %192 : vector<8xf32> to vector<8x1xf32>
    %cst_69 = arith.constant 1.600000e+01 : f32
    %194 = vector.broadcast %cst_69 : f32 to vector<8x1xf32>
    %195 = arith.divf %193, %194 : vector<8x1xf32>
    %cst_70 = arith.constant dense<0.000000e+00> : vector<1xf32>
    %196 = vector.multi_reduction <add>, %195, %cst_70 [0] : vector<8x1xf32> to vector<1xf32>
    %197 = vector.shape_cast %196 : vector<1xf32> to vector<1x1xf32>
    %cst_71 = arith.constant 8.000000e+00 : f32
    %198 = vector.broadcast %cst_71 : f32 to vector<1x1xf32>
    %199 = arith.divf %197, %198 : vector<1x1xf32>
    %200 = arith.addf %190, %199 : vector<1x1xf32>
    %cst_72 = arith.constant 5.000000e-01 : f32
    %201 = vector.broadcast %cst_72 : f32 to vector<1x1xf32>
    %202 = arith.mulf %201, %200 : vector<1x1xf32>
    %203 = math.absf %79 : vector<8x8xf32>
    %cst_73 = arith.constant dense<0.000000e+00> : vector<8xf32>
    %204 = vector.multi_reduction <add>, %203, %cst_73 [1] : vector<8x8xf32> to vector<8xf32>
    %205 = vector.shape_cast %204 : vector<8xf32> to vector<8x1xf32>
    %cst_74 = arith.constant dense<0.000000e+00> : vector<1xf32>
    %206 = vector.multi_reduction <add>, %205, %cst_74 [0] : vector<8x1xf32> to vector<1xf32>
    %207 = vector.shape_cast %206 : vector<1xf32> to vector<1x1xf32>
    %208 = math.absf %82 : vector<8x8xf32>
    %cst_75 = arith.constant dense<0.000000e+00> : vector<8xf32>
    %209 = vector.multi_reduction <add>, %208, %cst_75 [1] : vector<8x8xf32> to vector<8xf32>
    %210 = vector.shape_cast %209 : vector<8xf32> to vector<8x1xf32>
    %cst_76 = arith.constant dense<0.000000e+00> : vector<1xf32>
    %211 = vector.multi_reduction <add>, %210, %cst_76 [0] : vector<8x1xf32> to vector<1xf32>
    %212 = vector.shape_cast %211 : vector<1xf32> to vector<1x1xf32>
    %213 = arith.addf %207, %212 : vector<1x1xf32>
    %214 = tpu.iota {dimensions = array<i32: 1>} : vector<1x128xi32>
    %c0_i32 = arith.constant 0 : i32
    %215 = vector.broadcast %c0_i32 : i32 to vector<1x128xi32>
    %216 = arith.cmpi eq, %214, %215 : vector<1x128xi32>
    %cst_77 = arith.constant 0.000000e+00 : f32
    %217 = vector.shape_cast %179 : vector<1x1xf32> to vector<1x1xf32>
    %218 = vector.broadcast %217 : vector<1x1xf32> to vector<1x128xf32>
    %219 = vector.broadcast %cst_77 : f32 to vector<1x128xf32>
    %220 = arith.select %216, %218, %219 : vector<1x128xi1>, vector<1x128xf32>
    %c1_i32 = arith.constant 1 : i32
    %221 = vector.broadcast %c1_i32 : i32 to vector<1x128xi32>
    %222 = arith.cmpi eq, %214, %221 : vector<1x128xi32>
    %cst_78 = arith.constant 0.000000e+00 : f32
    %223 = vector.shape_cast %202 : vector<1x1xf32> to vector<1x1xf32>
    %224 = vector.broadcast %223 : vector<1x1xf32> to vector<1x128xf32>
    %225 = vector.broadcast %cst_78 : f32 to vector<1x128xf32>
    %226 = arith.select %222, %224, %225 : vector<1x128xi1>, vector<1x128xf32>
    %227 = arith.addf %220, %226 : vector<1x128xf32>
    %c2_i32 = arith.constant 2 : i32
    %228 = vector.broadcast %c2_i32 : i32 to vector<1x128xi32>
    %229 = arith.cmpi eq, %214, %228 : vector<1x128xi32>
    %cst_79 = arith.constant 0.000000e+00 : f32
    %230 = vector.shape_cast %213 : vector<1x1xf32> to vector<1x1xf32>
    %231 = vector.broadcast %230 : vector<1x1xf32> to vector<1x128xf32>
    %232 = vector.broadcast %cst_79 : f32 to vector<1x128xf32>
    %233 = arith.select %229, %231, %232 : vector<1x128xi1>, vector<1x128xf32>
    %234 = arith.addf %227, %233 : vector<1x128xf32>
    %c0_80 = arith.constant 0 : index
    %c0_81 = arith.constant 0 : index
    %235 = vector.load %arg10[%c0_80, %c0_81] : memref<1x128xf32, #tpu.memory_space<vmem>>, vector<1x128xf32>
    tpu.vector_store %arg10[%c0_80, %c0_81], %234 {strides = array<i32>} : memref<1x128xf32, #tpu.memory_space<vmem>>, vector<1x128xf32>,
    return
  }
}

</mosaic_0001>

<bundles_post_ra>
// kernel: common_mlp_encoder_forward.1
= control target key start
LH: loop header
LB: loop body
LE: loop exit
PB: predicated region body
PF: predicated region fallthrough
CT: control target
= control target key end

     0   :  { %16 = vsyncpa [#allocation3], 0  ;;  %s760_s0 = inlined_call_operand.vmem [shape: f32[8,32], index: 0, kind: input, shape index: {}]   ;;  %s761_s1 = inlined_call_operand.vmem [shape: f32[8,32], index: 1, kind: input, shape index: {}]   ;;  %s762_s2 = inlined_call_operand.vmem [shape: f32[8,8], index: 2, kind: input, shape index: {}]   ;;  %s763_s3 = inlined_call_operand.vmem [shape: f32[8,8], index: 3, kind: input, shape index: {}]   ;;  %s764_s4 = inlined_call_operand.vmem [shape: f32[32,16], index: 4, kind: input, shape index: {}]   ;;  %s765_s5 = inlined_call_operand.vmem [shape: f32[2,16], index: 5, kind: input, shape index: {}]   ;;  %s766_s6 = inlined_call_operand.vmem [shape: f32[16,32], index: 6, kind: input, shape index: {}]   ;;  %s767_s7 = inlined_call_operand.vmem [shape: f32[2,32], index: 7, kind: input, shape index: {}]   ;;  %s768_s8 = inlined_call_operand.hbm [shape: f32[8,8], index: 8, kind: output, shape index: {0}]   ;;  %s769_s9 = inlined_call_operand.hbm [shape: f32[8,8], index: 9, kind: output, shape index: {1}]   ;;  %s770_s10 = inlined_call_operand.vmem [shape: f32[1,128], index: 10, kind: output, shape index: {2}]  }
   0x1   :  { %v39_v0 = vld [vmem:[%s764_s4 + $0x18] sm:$0xff]  ;;  %v38_v1 = vld [vmem:[%s764_s4 + $0x10] sm:$0xff]  ;;  %v37_v2 = vld [vmem:[%s764_s4 + $0x8] sm:$0xff] }
   0x2   :  { %59 = vmatpush.msra.mxu0 %v39_v0 }
   0x3   :  { %17 = vsyncpa [#allocation5], 0  ;;  %v36_v3 = vld [vmem:[%s764_s4] sm:$0xff]  ;;  %vm40_vm0 = vcmask 261120   ;;  %v591_v6 = vmov 8.0   ;;  %vm71_vm1 = vcmask 130048  }
   0x4   :  { %60 = vmatpush.msra.mxu0 %v38_v1  ;;  %v666_v4 = vld [vmem:[%s760_s0] sm:$0xff]  ;;  %517 = vrcp.f32 %v591_v6  ;;  %vm189_vm10 = vcmask 64512   ;;  %s477_s13 = sshll.u32 %s768_s8, 4  ;;  %s593_s14 = smov [#allocation4]   ;;  %s478_s13 = int_to_ptr.hbm [resolvable:$true] %s477_s13 }
   0x5   :  { %v673_v5 = vld [vmem:[%s761_s1] sm:$0xff]  ;;  %s486_s15 = sshll.u32 %s593_s14, 4  ;;  %s488_s18 = sshll.u32 %s769_s9, 4  ;;  %s487_s15 = int_to_ptr.vmem [resolvable:$true] %s486_s15  ;;  %s489_s18 = int_to_ptr.hbm [resolvable:$true] %s488_s18 }
   0x6   :  { %61 = vmatpush.msra.mxu0 %v37_v2  ;;  %v70_v59 = vld [vmem:[%s765_s5] sm:$0x3] }
   0x8   :  { %62 = vmatpush.msra.mxu0 %v36_v3  ;;  %v111_v3 = vperm.slane %v70_v59, 1 }
   0x9   :  { %506 = vmatmul.msk.f32.vlgmr.msra.gmra.mxu0 %vm40_vm0, %v666_v4 }
   0xa   :  { %v518_v7 = vpop.eup %517 }
   0xb   :  { %v80_v8 = vmul.f32 8.0, %v518_v7  ;;  %vm84_vm2 = vweird.f32 %v518_v7 }
   0xd   :  { %v81_v9 = vsub.f32 1.0, %v80_v8 }
   0xf   :  { %v82_v13 = vmul.f32 %v518_v7, %v81_v9 }
  0x11   :  { %507 = vmatmul.msk.f32.gmra.mxu0 %vm40_vm0, %v673_v5  ;;  %v83_v16 = vadd.f32 %v518_v7, %v82_v13 }
  0x13   :  { %v679_v22 = vsel %vm84_vm2, %v518_v7, %v83_v16 }
  0x86   :  { %v64_v10 = vpop.f32.mrf.mxu0 }
  0x87   :  { %v72_v11 = vsel %vm71_vm1, %v64_v10, 0.0 }
  0x88   :  { %v73_v12 = vrot.slane %v72_v11, 4 }
  0x8a   :  { %v74_v14 = vadd.f32 %v73_v12, %v72_v11 }
  0x8c   :  { %v75_v15 = vrot.slane %v74_v14, 2 }
  0x8e   :  { %v76_v17 = vadd.f32 %v75_v15, %v74_v14  ;;  %v67_v18 = vpop.f32.mrf.mxu0 }
  0x8f   :  { %v130_v19 = vsel %vm71_vm1, %v67_v18, 0.0 }
  0x90   :  { %v77_v20 = vrot.slane %v76_v17, 1  ;;  %v131_v21 = vrot.slane %v130_v19, 4 }
  0x92   :  { %v78_v23 = vadd.f32 %v77_v20, %v76_v17  ;;  %v132_v24 = vadd.f32 %v131_v21, %v130_v19  ;;  %v180_v21 = vlaneseq }
  0x94   :  { %v86_v25 = vmul.f32 %v679_v22, %v78_v23  ;;  %v133_v26 = vrot.slane %v132_v24, 2  ;;  %v181_v23 = vshrl.u32 %v180_v21, 7 }
  0x96   :  { %v87_v27 = vsub.f32 %v64_v10, %v86_v25  ;;  %v134_v28 = vadd.f32 %v133_v26, %v132_v24  ;;  %v692_v24 = vand.u32 127, %v180_v21  ;;  %v185_v25 = vld [vmem:[%s762_s2] sm:$0xff] }
  0x98   :  { %v88_v29 = vmul.f32 %v87_v27, %v87_v27  ;;  %v135_v30 = vrot.slane %v134_v28, 1  ;;  %vm184_vm9 = vcmp.ne.s32.totalorder %v181_v23, %v692_v24 }
  0x99   :  { %v698_v26 = vsel %vm184_vm9, %v185_v25, 0.0 }
  0x9a   :  { %v89_v31 = vsel %vm71_vm1, %v88_v29, 0.0  ;;  %v136_v32 = vadd.f32 %v135_v30, %v134_v28  ;;  %190 = vst.msk [vmem:[#allocation2] sm:$0xff] %vm189_vm10, %v698_v26  ;;  %v239_v30 = vld [vmem:[%s766_s6 + $0x8] sm:$0xff] }
  0x9b   :  { %v90_v33 = vrot.slane %v89_v31, 4  ;;  %260 = vmatpush.msra.mxu3 %v239_v30 }
  0x9c   :  { %v137_v34 = vmul.f32 %v136_v32, %v679_v22 }
  0x9d   :  { %v91_v35 = vadd.f32 %v90_v33, %v89_v31 }
  0x9e   :  { %v138_v36 = vsub.f32 %v67_v18, %v137_v34 }
  0x9f   :  { %v92_v37 = vrot.slane %v91_v35, 2 }
  0xa0   :  { %v139_v38 = vmul.f32 %v138_v36, %v138_v36 }
  0xa1   :  { %v93_v39 = vadd.f32 %v92_v37, %v91_v35 }
  0xa2   :  { %v140_v40 = vsel %vm71_vm1, %v139_v38, 0.0 }
  0xa3   :  { %v94_v41 = vrot.slane %v93_v39, 1  ;;  %v141_v42 = vrot.slane %v140_v40, 4 }
  0xa5   :  { %v95_v43 = vadd.f32 %v94_v41, %v93_v39  ;;  %v142_v44 = vadd.f32 %v141_v42, %v140_v40 }
  0xa7   :  { %v96_v45 = vmul.f32 %v95_v43, %v679_v22  ;;  %v143_v46 = vrot.slane %v142_v44, 2 }
  0xa9   :  { %v97_v47 = vadd.f32 1e-05, %v96_v45  ;;  %v144_v48 = vadd.f32 %v143_v46, %v142_v44 }
  0xab   :  { %519 = vrsqrt.f32 %v97_v47  ;;  %v145_v49 = vrot.slane %v144_v48, 1  ;;  %vm104_vm4 = vweird.f32 %v97_v47 }
  0xad   :  { %v146_v50 = vadd.f32 %v145_v49, %v144_v48 }
  0xaf   :  { %v147_v51 = vmul.f32 %v146_v50, %v679_v22  ;;  %v238_v50 = vld [vmem:[%s766_s6] sm:$0xff] }
  0xb0   :  { %261 = vmatpush.msra.mxu3 %v238_v50 }
  0xb1   :  { %v520_v52 = vpop.eup %519  ;;  %v148_v53 = vadd.f32 1e-05, %v147_v51 }
  0xb2   :  { %v99_v54 = vmul.f32 %v520_v52, %v97_v47  ;;  %vm105_vm3 = vweird.f32 %v520_v52 }
  0xb3   :  { %521 = vrsqrt.f32 %v148_v53  ;;  %vm106_vm5 = vmor %vm104_vm4, %vm105_vm3  ;;  %vm155_vm7 = vweird.f32 %v148_v53 }
  0xb4   :  { %v100_v55 = vmul.f32 %v520_v52, %v99_v54 }
  0xb6   :  { %v101_v56 = vmul.f32 0.5, %v100_v55 }
  0xb8   :  { %v102_v57 = vsub.f32 1.5, %v101_v56 }
  0xb9   :  { %v522_v58 = vpop.eup %521 }
  0xba   :  { %v103_v60 = vmul.f32 %v520_v52, %v102_v57  ;;  %v150_v61 = vmul.f32 %v522_v58, %v148_v53  ;;  %vm156_vm6 = vweird.f32 %v522_v58 }
  0xbb   :  { %vm157_vm8 = vmor %vm155_vm7, %vm156_vm6 }
  0xbc   :  { %v107_v62 = vsel %vm106_vm5, %v520_v52, %v103_v60  ;;  %v151_v63 = vmul.f32 %v522_v58, %v150_v61 }
  0xbd   :  { %v108_v0 = vmul.f32 %v107_v62, %v70_v59 }
  0xbe   :  { %v152_v1 = vmul.f32 0.5, %v151_v63 }
  0xbf   :  { %v109_v2 = vperm.slane %v108_v0, 0 }
  0xc0   :  { %v153_v6 = vsub.f32 1.5, %v152_v1 }
  0xc1   :  { %v110_v7 = vmul.f32 %v109_v2, %v87_v27  ;;  %v187_v27 = vld [vmem:[%s763_s3] sm:$0xff] }
  0xc2   :  { %v154_v8 = vmul.f32 %v522_v58, %v153_v6  ;;  %v705_v28 = vsel %vm184_vm9, %v187_v27, 0.0 }
  0xc3   :  { %v112_v9 = vadd.f32 %v111_v3, %v110_v7  ;;  %191 = vst.msk [vmem:[#allocation4] sm:$0xff] %vm189_vm10, %v705_v28 }
  0xc4   :  { %v158_v10 = vsel %vm157_vm8, %v522_v58, %v154_v8  ;;  %491 = dma.vmem_to_hbm [thread:$0]  %s487_s15, 128, %s489_s18, [#allocation5]  }
  0xc5   :  { %v159_v11 = vmul.f32 %v158_v10, %v70_v59  ;;  %v113_v12 = vmax.f32 %v112_v9, 0.0 }
  0xc7   :  { %v160_v13 = vperm.slane %v159_v11, 0  ;;  %v114_v14 = vmul.f32 %v113_v12, %v113_v12 }
  0xc9   :  { %v161_v15 = vmul.f32 %v160_v13, %v138_v36  ;;  %v115_v16 = vsel %vm71_vm1, %v114_v14, 0.0 }
  0xca   :  { %116 = vadd.xlane.f32.xlu0 %v115_v16 }
  0xcb   :  { %v162_v17 = vadd.f32 %v161_v15, %v111_v3 }
  0xcd   :  { %v163_v18 = vmax.f32 %v162_v17, 0.0 }
  0xcf   :  { %v164_v19 = vmul.f32 %v163_v18, %v163_v18 }
  0xd1   :  { %v165_v20 = vsel %vm71_vm1, %v164_v19, 0.0 }
  0xd2   :  { %166 = vadd.xlane.f32.xlu0 %v165_v20 }
 0x13d   :  { %v117_v29 = vpop.xlane.xlu0 %116 }
 0x13e   :  { %v118_v31 = vmax.f32 %v117_v29, 1e-24 }
 0x140   :  { %523 = vrsqrt.f32 %v118_v31  ;;  %vm125_vm12 = vweird.f32 %v118_v31 }
 0x145   :  { %v167_v32 = vpop.xlane.xlu0 %166 }
 0x146   :  { %v524_v33 = vpop.eup %523  ;;  %v168_v34 = vmax.f32 %v167_v32, 1e-24 }
 0x147   :  { %v120_v35 = vmul.f32 %v524_v33, %v118_v31  ;;  %vm126_vm11 = vweird.f32 %v524_v33 }
 0x148   :  { %525 = vrsqrt.f32 %v168_v34  ;;  %vm127_vm13 = vmor %vm125_vm12, %vm126_vm11  ;;  %vm175_vm15 = vweird.f32 %v168_v34 }
 0x149   :  { %v121_v36 = vmul.f32 %v524_v33, %v120_v35 }
 0x14b   :  { %v122_v37 = vmul.f32 0.5, %v121_v36 }
 0x14d   :  { %v123_v38 = vsub.f32 1.5, %v122_v37 }
 0x14e   :  { %v526_v39 = vpop.eup %525 }
 0x14f   :  { %v170_v40 = vmul.f32 %v526_v39, %v168_v34  ;;  %v124_v41 = vmul.f32 %v524_v33, %v123_v38  ;;  %vm176_vm14 = vweird.f32 %v526_v39 }
 0x150   :  { %vm177_vm2 = vmor %vm175_vm15, %vm176_vm14  ;;  %vm461_vm15 = vcmp.eq.s32.totalorder %v692_v24, 0 }
 0x151   :  { %v171_v42 = vmul.f32 %v526_v39, %v170_v40  ;;  %v128_v43 = vsel %vm127_vm13, %v524_v33, %v124_v41 }
 0x152   :  { %v129_v44 = vmul.f32 %v128_v43, %v113_v12 }
 0x153   :  { %v172_v45 = vmul.f32 0.5, %v171_v42 }
 0x154   :  { %210 = vmatpush.msra.mxu1 %v129_v44 }
 0x155   :  { %v173_v46 = vsub.f32 1.5, %v172_v45  ;;  %508 = vmatmul.msk.f32.vlgmr.msra.gmra.mxu1 %vm189_vm10, %v698_v26 }
 0x157   :  { %v174_v47 = vmul.f32 %v526_v39, %v173_v46  ;;  %v269_v46 = vld [vmem:[%s767_s7] sm:$0x3]  ;;  %s592_s7 = smov [#allocation2]  }
 0x158   :  { %s475_s30 = sshll.u32 %s592_s7, 4  ;;  %s476_s30 = int_to_ptr.vmem [resolvable:$true] %s475_s30 }
 0x159   :  { %v178_v48 = vsel %vm177_vm2, %v526_v39, %v174_v47  ;;  %480 = dma.vmem_to_hbm [thread:$0]  %s476_s30, 128, %s478_s13, [#allocation3]   ;;  %vm463_vm2 = vcmp.eq.s32.totalorder %v692_v24, 1 }
 0x15a   :  { %v179_v49 = vmul.f32 %v178_v48, %v163_v18 }
 0x15c   :  { %233 = vmatpush.msra.mxu2 %v179_v49 }
 0x15d   :  { %509 = vmatmul.msk.f32.vlgmr.msra.gmra.mxu2 %vm189_vm10, %v705_v28 }
 0x1d2   :  { %v212_v51 = vpop.f32.mrf.mxu1 }
 0x1d3   :  { %v405_v52 = vsub.f32 %v129_v44, %v212_v51  ;;  %510 = vmatmul.msk.f32.vlgmr.msra.gmra.mxu3 %vm71_vm1, %v212_v51 }
 0x1d5   :  { %v407_v53 = vmul.f32 %v405_v52, %v405_v52  ;;  %v302_v52 = vperm.slane %v269_v46, 1 }
 0x1d7   :  { %v408_v54 = vsel %vm71_vm1, %v407_v53, 0.0 }
 0x1d8   :  { %409 = vadd.xlane.f32.xlu2 %v408_v54 }
 0x1e0   :  { %v235_v55 = vpop.f32.mrf.mxu2 }
 0x1e1   :  { %v406_v56 = vsub.f32 %v179_v49, %v235_v55  ;;  %511 = vmatmul.msk.f32.gmra.mxu3 %vm71_vm1, %v235_v55 }
 0x1e3   :  { %v426_v57 = vmul.f32 %v406_v56, %v406_v56 }
 0x1e5   :  { %v427_v58 = vsel %vm71_vm1, %v426_v57, 0.0 }
 0x1e6   :  { %428 = vadd.xlane.f32.xlu2 %v427_v58 }
 0x256   :  { %v263_v59 = vpop.f32.mrf.mxu3 }
 0x257   :  { %v270_v60 = vsel %vm40_vm0, %v263_v59, 0.0 }
 0x258   :  { %v271_v61 = vrot.slane %v270_v60, 4 }
 0x25a   :  { %v272_v62 = vadd.f32 %v271_v61, %v270_v60 }
 0x25c   :  { %v273_v63 = vrot.slane %v272_v62, 2 }
 0x25e   :  { %v274_v0 = vadd.f32 %v273_v63, %v272_v62 }
 0x260   :  { %v275_v1 = vrot.slane %v274_v0, 1 }
 0x262   :  { %v276_v2 = vadd.f32 %v275_v1, %v274_v0 }
 0x264   :  { %v277_v3 = vmul.f32 %v276_v2, %v679_v22  ;;  %v266_v6 = vpop.f32.mrf.mxu3 }
 0x265   :  { %v321_v7 = vsel %vm40_vm0, %v266_v6, 0.0 }
 0x266   :  { %v278_v8 = vsub.f32 %v263_v59, %v277_v3  ;;  %v322_v9 = vrot.slane %v321_v7, 4 }
 0x268   :  { %v279_v10 = vmul.f32 %v278_v8, %v278_v8  ;;  %v323_v11 = vadd.f32 %v322_v9, %v321_v7 }
 0x26a   :  { %v280_v12 = vsel %vm40_vm0, %v279_v10, 0.0  ;;  %v324_v13 = vrot.slane %v323_v11, 2 }
 0x26b   :  { %v281_v14 = vrot.slane %v280_v12, 4 }
 0x26c   :  { %v325_v15 = vadd.f32 %v324_v13, %v323_v11  ;;  %v440_v11 = vand.u32 2147483647, %v698_v26 }
 0x26d   :  { %v282_v16 = vadd.f32 %v281_v14, %v280_v12 }
 0x26e   :  { %v326_v17 = vrot.slane %v325_v15, 1  ;;  %v441_v12 = vsel %vm189_vm10, %v440_v11, 0.0 }
 0x26f   :  { %v283_v18 = vrot.slane %v282_v16, 2  ;;  %442 = vadd.xlane.f32.xlu2 %v441_v12 }
 0x270   :  { %v327_v19 = vadd.f32 %v326_v17, %v325_v15 }
 0x271   :  { %v284_v20 = vadd.f32 %v283_v18, %v282_v16 }
 0x272   :  { %v328_v21 = vmul.f32 %v327_v19, %v679_v22 }
 0x273   :  { %v285_v23 = vrot.slane %v284_v20, 1 }
 0x274   :  { %v329_v25 = vsub.f32 %v266_v6, %v328_v21 }
 0x275   :  { %v286_v27 = vadd.f32 %v285_v23, %v284_v20 }
 0x276   :  { %v330_v29 = vmul.f32 %v329_v25, %v329_v25 }
 0x277   :  { %v287_v30 = vmul.f32 %v286_v27, %v679_v22 }
 0x278   :  { %v331_v31 = vsel %vm40_vm0, %v330_v29, 0.0 }
 0x279   :  { %v288_v32 = vadd.f32 1e-05, %v287_v30  ;;  %v332_v33 = vrot.slane %v331_v31, 4 }
 0x27b   :  { %527 = vrsqrt.f32 %v288_v32  ;;  %v333_v34 = vadd.f32 %v332_v33, %v331_v31  ;;  %vm295_vm3 = vweird.f32 %v288_v32  ;;  %v450_v33 = vand.u32 2147483647, %v705_v28 }
 0x27d   :  { %v334_v35 = vrot.slane %v333_v34, 2 }
 0x27f   :  { %v335_v36 = vadd.f32 %v334_v35, %v333_v34 }
 0x281   :  { %v528_v37 = vpop.eup %527  ;;  %v336_v38 = vrot.slane %v335_v36, 1 }
 0x282   :  { %v290_v39 = vmul.f32 %v528_v37, %v288_v32  ;;  %vm296_vm1 = vweird.f32 %v528_v37 }
 0x283   :  { %v337_v40 = vadd.f32 %v336_v38, %v335_v36  ;;  %vm297_vm4 = vmor %vm295_vm3, %vm296_vm1  ;;  %v451_v36 = vsel %vm189_vm10, %v450_v33, 0.0  ;;  %vm466_vm1 = vcmp.eq.s32.totalorder %v692_v24, 2 }
 0x284   :  { %v291_v41 = vmul.f32 %v528_v37, %v290_v39 }
 0x285   :  { %v338_v42 = vmul.f32 %v337_v40, %v679_v22 }
 0x286   :  { %v292_v43 = vmul.f32 0.5, %v291_v41  ;;  %v595_v41 = vmov 32.0  }
 0x287   :  { %v339_v44 = vadd.f32 1e-05, %v338_v42 }
 0x288   :  { %v293_v45 = vsub.f32 1.5, %v292_v43 }
 0x289   :  { %529 = vrsqrt.f32 %v339_v44  ;;  %vm346_vm6 = vweird.f32 %v339_v44 }
 0x28a   :  { %v294_v47 = vmul.f32 %v528_v37, %v293_v45  ;;  %v410_v45 = vpop.xlane.xlu2 %409 }
 0x28c   :  { %v298_v48 = vsel %vm297_vm4, %v528_v37, %v294_v47 }
 0x28d   :  { %v299_v49 = vmul.f32 %v298_v48, %v269_v46 }
 0x28f   :  { %v530_v50 = vpop.eup %529  ;;  %v300_v51 = vperm.slane %v299_v49, 0 }
 0x290   :  { %v341_v53 = vmul.f32 %v530_v50, %v339_v44  ;;  %vm347_vm5 = vweird.f32 %v530_v50 }
 0x291   :  { %v301_v54 = vmul.f32 %v300_v51, %v278_v8  ;;  %vm348_vm7 = vmor %vm346_vm6, %vm347_vm5 }
 0x292   :  { %v342_v55 = vmul.f32 %v530_v50, %v341_v53 }
 0x293   :  { %v303_v56 = vadd.f32 %v302_v52, %v301_v54 }
 0x294   :  { %v343_v57 = vmul.f32 0.5, %v342_v55 }
 0x295   :  { %v304_v58 = vmax.f32 %v303_v56, 0.0 }
 0x296   :  { %v344_v59 = vsub.f32 1.5, %v343_v57 }
 0x297   :  { %v305_v60 = vmul.f32 %v304_v58, %v304_v58 }
 0x298   :  { %v345_v61 = vmul.f32 %v530_v50, %v344_v59 }
 0x299   :  { %v306_v62 = vsel %vm40_vm0, %v305_v60, 0.0 }
 0x29a   :  { %v349_v63 = vsel %vm348_vm7, %v530_v50, %v345_v61  ;;  %307 = vadd.xlane.f32.xlu1 %v306_v62  ;;  %v429_v50 = vpop.xlane.xlu2 %428 }
 0x29b   :  { %v350_v0 = vmul.f32 %v349_v63, %v269_v46 }
 0x29d   :  { %v351_v1 = vperm.slane %v350_v0, 0 }
 0x29f   :  { %v352_v2 = vmul.f32 %v351_v1, %v329_v25 }
 0x2a1   :  { %v353_v3 = vadd.f32 %v352_v2, %v302_v52 }
 0x2a3   :  { %v354_v6 = vmax.f32 %v353_v3, 0.0 }
 0x2a5   :  { %v355_v7 = vmul.f32 %v354_v6, %v354_v6 }
 0x2a7   :  { %v356_v8 = vsel %vm40_vm0, %v355_v7, 0.0 }
 0x2a8   :  { %357 = vadd.xlane.f32.xlu1 %v356_v8 }
 0x2e2   :  { %v443_v63 = vpop.xlane.xlu2 %442 }
 0x2e3   :  { %v444_v3 = vrot.slane %v443_v63, 4 }
 0x2e5   :  { %v445_v11 = vadd.f32 %v444_v3, %v443_v63 }
 0x30d   :  { %v308_v9 = vpop.xlane.xlu1 %307 }
 0x30e   :  { %v309_v10 = vmax.f32 %v308_v9, 1e-24 }
 0x310   :  { %531 = vrsqrt.f32 %v309_v10  ;;  %vm316_vm9 = vweird.f32 %v309_v10 }
 0x316   :  { %v532_v13 = vpop.eup %531 }
 0x317   :  { %v311_v14 = vmul.f32 %v532_v13, %v309_v10  ;;  %vm317_vm8 = vweird.f32 %v532_v13 }
 0x318   :  { %vm318_vm11 = vmor %vm316_vm9, %vm317_vm8 }
 0x319   :  { %v312_v15 = vmul.f32 %v532_v13, %v311_v14 }
 0x31b   :  { %v313_v16 = vmul.f32 0.5, %v312_v15  ;;  %v358_v17 = vpop.xlane.xlu1 %357 }
 0x31c   :  { %v359_v18 = vmax.f32 %v358_v17, 1e-24  ;;  %v446_v17 = vrot.slane %v445_v11, 2 }
 0x31d   :  { %v314_v19 = vsub.f32 1.5, %v313_v16 }
 0x31e   :  { %533 = vrsqrt.f32 %v359_v18  ;;  %vm366_vm13 = vweird.f32 %v359_v18 }
 0x31f   :  { %v315_v20 = vmul.f32 %v532_v13, %v314_v19 }
 0x321   :  { %v319_v21 = vsel %vm318_vm11, %v532_v13, %v315_v20 }
 0x322   :  { %v320_v23 = vmul.f32 %v319_v21, %v304_v58 }
 0x324   :  { %v534_v25 = vpop.eup %533  ;;  %v371_v26 = vsub.f32 %v666_v4, %v320_v23 }
 0x325   :  { %v361_v27 = vmul.f32 %v534_v25, %v359_v18  ;;  %vm367_vm12 = vweird.f32 %v534_v25 }
 0x326   :  { %v373_v29 = vmul.f32 %v371_v26, %v371_v26  ;;  %vm368_vm14 = vmor %vm366_vm13, %vm367_vm12  ;;  %v447_v26 = vadd.f32 %v446_v17, %v445_v11 }
 0x327   :  { %v362_v30 = vmul.f32 %v534_v25, %v361_v27 }
 0x328   :  { %v374_v31 = vsel %vm40_vm0, %v373_v29, 0.0 }
 0x329   :  { %v363_v32 = vmul.f32 0.5, %v362_v30  ;;  %375 = vadd.xlane.f32.xlu0 %v374_v31 }
 0x32b   :  { %v364_v34 = vsub.f32 1.5, %v363_v32 }
 0x32d   :  { %v365_v35 = vmul.f32 %v534_v25, %v364_v34  ;;  %v448_v34 = vrot.slane %v447_v26, 1 }
 0x32f   :  { %v369_v37 = vsel %vm368_vm14, %v534_v25, %v365_v35 }
 0x330   :  { %v370_v38 = vmul.f32 %v369_v37, %v354_v6 }
 0x331   :  { %452 = vadd.xlane.f32.xlu0 %v451_v36 }
 0x332   :  { %v372_v4 = vsub.f32 %v673_v5, %v370_v38  ;;  %v594_v5 = vmov 16.0  }
 0x333   :  { %535 = vrcp.f32 %v594_v5 }
 0x334   :  { %v392_v39 = vmul.f32 %v372_v4, %v372_v4  ;;  %537 = vrcp.f32 %v595_v41 }
 0x336   :  { %v393_v40 = vsel %vm40_vm0, %v392_v39, 0.0  ;;  %v449_v39 = vadd.f32 %v448_v34, %v447_v26 }
 0x337   :  { %394 = vadd.xlane.f32.xlu1 %v393_v40 }
 0x339   :  { %v536_v28 = vpop.eup %535 }
 0x33a   :  { %v412_v42 = vmul.f32 16.0, %v536_v28  ;;  %v538_v43 = vpop.eup %537  ;;  %vm416_vm0 = vweird.f32 %v536_v28 }
 0x33b   :  { %v378_v46 = vmul.f32 32.0, %v538_v43  ;;  %vm382_vm10 = vweird.f32 %v538_v43 }
 0x33c   :  { %v413_v44 = vsub.f32 1.0, %v412_v42 }
 0x33d   :  { %v379_v48 = vsub.f32 1.0, %v378_v46 }
 0x33e   :  { %v414_v47 = vmul.f32 %v536_v28, %v413_v44 }
 0x33f   :  { %v380_v51 = vmul.f32 %v538_v43, %v379_v48 }
 0x340   :  { %v415_v49 = vadd.f32 %v536_v28, %v414_v47 }
 0x341   :  { %v381_v54 = vadd.f32 %v538_v43, %v380_v51 }
 0x342   :  { %v417_v52 = vsel %vm416_vm0, %v536_v28, %v415_v49 }
 0x343   :  { %v430_v53 = vmul.f32 %v429_v50, %v417_v52  ;;  %v418_v55 = vmul.f32 %v417_v52, %v410_v45  ;;  %v383_v57 = vsel %vm382_vm10, %v538_v43, %v381_v54 }
 0x345   :  { %v431_v56 = vrot.slane %v430_v53, 4  ;;  %v419_v58 = vrot.slane %v418_v55, 4 }
 0x347   :  { %v432_v60 = vadd.f32 %v431_v56, %v430_v53  ;;  %v420_v62 = vadd.f32 %v419_v58, %v418_v55 }
 0x349   :  { %v433_v0 = vrot.slane %v432_v60, 2  ;;  %v421_v2 = vrot.slane %v420_v62, 2 }
 0x34b   :  { %v434_v7 = vadd.f32 %v433_v0, %v432_v60  ;;  %v422_v10 = vadd.f32 %v421_v2, %v420_v62 }
 0x34d   :  { %v435_v13 = vrot.slane %v434_v7, 1  ;;  %v423_v16 = vrot.slane %v422_v10, 1 }
 0x34f   :  { %v436_v20 = vadd.f32 %v435_v13, %v434_v7  ;;  %v424_v25 = vadd.f32 %v423_v16, %v422_v10 }
 0x351   :  { %v437_v30 = vmul.f32 %v436_v20, %v679_v22  ;;  %v425_v33 = vmul.f32 %v424_v25, %v679_v22 }
 0x353   :  { %v438_v37 = vadd.f32 %v437_v30, %v425_v33 }
 0x355   :  { %v439_v28 = vmul.f32 0.5, %v438_v37 }
 0x357   :  { %v464_v46 = vsel %vm463_vm2, %v439_v28, 0.0 }
 0x39c   :  { %v376_v59 = vpop.xlane.xlu0 %375 }
 0x39d   :  { %v384_v61 = vmul.f32 %v383_v57, %v376_v59 }
 0x39f   :  { %v385_v1 = vrot.slane %v384_v61, 4 }
 0x3a1   :  { %v386_v8 = vadd.f32 %v385_v1, %v384_v61 }
 0x3a3   :  { %v387_v14 = vrot.slane %v386_v8, 2 }
 0x3a4   :  { %v453_v6 = vpop.xlane.xlu0 %452 }
 0x3a5   :  { %v454_v9 = vrot.slane %v453_v6, 4  ;;  %v388_v21 = vadd.f32 %v387_v14, %v386_v8 }
 0x3a7   :  { %v455_v12 = vadd.f32 %v454_v9, %v453_v6  ;;  %v389_v31 = vrot.slane %v388_v21, 1 }
 0x3a9   :  { %v456_v19 = vrot.slane %v455_v12, 2  ;;  %v390_v38 = vadd.f32 %v389_v31, %v388_v21 }
 0x3aa   :  { %v395_v15 = vpop.xlane.xlu1 %394 }
 0x3ab   :  { %v396_v18 = vmul.f32 %v395_v15, %v383_v57  ;;  %v457_v29 = vadd.f32 %v456_v19, %v455_v12  ;;  %v391_v41 = vmul.f32 %v390_v38, %v679_v22 }
 0x3ad   :  { %v397_v23 = vrot.slane %v396_v18, 4  ;;  %v458_v36 = vrot.slane %v457_v29, 1 }
 0x3af   :  { %v398_v27 = vadd.f32 %v397_v23, %v396_v18  ;;  %v459_v5 = vadd.f32 %v458_v36, %v457_v29 }
 0x3b1   :  { %v399_v32 = vrot.slane %v398_v27, 2  ;;  %v460_v44 = vadd.f32 %v459_v5, %v449_v39 }
 0x3b3   :  { %v400_v35 = vadd.f32 %v399_v32, %v398_v27  ;;  %v467_v48 = vsel %vm466_vm1, %v460_v44, 0.0 }
 0x3b5   :  { %v401_v4 = vrot.slane %v400_v35, 1 }
 0x3b7   :  { %v402_v40 = vadd.f32 %v401_v4, %v400_v35 }
 0x3b9   :  { %v403_v42 = vmul.f32 %v402_v40, %v679_v22 }
 0x3bb   :  { %v404_v43 = vadd.f32 %v403_v42, %v391_v41 }
 0x3bd   :  { %v462_v45 = vsel %vm461_vm15, %v404_v43, 0.0 }
 0x3be   :  { %v465_v47 = vadd.f32 %v464_v46, %v462_v45 }
 0x3c0   :  { %v468_v49 = vadd.f32 %v467_v48, %v465_v47 }
 0x3c2   :  { %469 = vst [vmem:[%s770_s10] sm:$0x1] %v468_v49 }
 0x3c3   :  { %587 = dma.done.wait [#allocation3], 128  }
 0x3c4   :  { %588 = vsyncadd [#allocation3], 4294967168 }
 0x3c5   :  { %589 = dma.done.wait [#allocation5], 128  }
 0x3c6   :  { %590 = vsyncadd [#allocation5], 4294967168 }
 0x3c7   :  { %504 = vsyncpa [#allocation3], 1 }
 0x3c8   :  { %505 = vsyncpa [#allocation5], 1 }

</bundles_post_ra>
